<compile_context>
chip_gen: v5e
topology: v5e:2x2
jax: 0.10.0
libtpu: 0.0.40
codegen_flags: <defaults>
</compile_context>

<pallas_src>
import jax
import jax.numpy as jnp
from jax.experimental import pallas as pl
from jax.experimental.pallas import tpu as pltpu

_LANES = 128           # TPU lane width (last dim of every block)
_MAX_BLOCK_ROWS = 2048 # 2048 x 128 x 4B = 1 MiB per f32 block (fits all gens
                       # comfortably with double-buffered in + out blocks)


def _silu_kernel(x_ref, o_ref):
    # x_ref / o_ref: (block_rows, 128) tiles in VMEM.
    x = x_ref[...].astype(jnp.float32)          # per-tile promote for accuracy
    sig = 1.0 / (1.0 + jnp.exp(-x))             # sigmoid: EUP exp + VPU ops
    o_ref[...] = (x * sig).astype(o_ref.dtype)


def nonlinearity(x: jax.Array) -> jax.Array:
    """x * sigmoid(x) (SiLU/swish), elementwise, via a tiled Pallas TPU kernel."""
    orig_shape = x.shape
    orig_dtype = x.dtype

    n = x.size
    total_rows = pl.cdiv(n, _LANES)

    # Row-tile size: multiple of 8 sublanes, capped at _MAX_BLOCK_ROWS.
    block_rows = min(_MAX_BLOCK_ROWS, max(8, ((total_rows + 7) // 8) * 8))

    # Pad the flattened array up to a whole number of (block_rows, 128) blocks.
    rows = pl.cdiv(total_rows, block_rows) * block_rows
    n_pad = rows * _LANES
    x_flat = jnp.ravel(x)
    if n_pad != n:
        x_flat = jnp.pad(x_flat, (0, n_pad - n))
    x2d = x_flat.reshape(rows, _LANES)

    grid = (rows // block_rows,)

    out2d = pl.pallas_call(
        _silu_kernel,
        out_shape=jax.ShapeDtypeStruct((rows, _LANES), orig_dtype),
        grid=grid,
        in_specs=[pl.BlockSpec((block_rows, _LANES), lambda i: (i, 0))],
        out_specs=pl.BlockSpec((block_rows, _LANES), lambda i: (i, 0)),
        compiler_params=pltpu.CompilerParams(
            dimension_semantics=("parallel",),  # elementwise: megacore-shardable
        ),
    )(x2d)

    return out2d.reshape(-1)[:n].reshape(orig_shape)


def _reference(x):
    return x * jax.nn.sigmoid(x)


if __name__ == "__main__":
    key = jax.random.PRNGKey(0)

    # Small shape consistent with a conv-net nonlinearity: (B, C, H, W).
    x = jax.random.normal(key, (2, 4, 16, 16), dtype=jnp.float32)
    out = jax.block_until_ready(nonlinearity(x))
    ref = _reference(x)
    assert out.shape == x.shape, out.shape
    assert jnp.allclose(out, ref, atol=1e-5, rtol=1e-5), "mismatch vs reference"

    # Ragged / non-lane-aligned shape exercises the padding + tiling path.
    x2 = jax.random.normal(jax.random.PRNGKey(1), (3, 5, 7, 11), dtype=jnp.float32)
    out2 = jax.block_until_ready(nonlinearity(x2))
    ref2 = _reference(x2)
    assert out2.shape == x2.shape, out2.shape
    assert jnp.allclose(out2, ref2, atol=1e-5, rtol=1e-5), "mismatch vs reference (ragged)"

    print("KERNEL_OK")
</pallas_src>

<mosaic_0001>
module attributes {stable_mosaic.version = 11 : i64} {
  func.func @_silu_kernel(%arg0: i32, %arg1: memref<16x128xf32, #tpu.memory_space<vmem>>, %arg2: memref<16x128xf32, #tpu.memory_space<vmem>>) attributes {dimension_semantics = [#tpu.dimension_semantics<parallel>], iteration_bounds = array<i64: 1>, scalar_prefetch = 0 : i64, scratch_operands = 0 : i64, tpu.core_type = #tpu.core_type<tc>, window_params = [{transform_indices = @transform_0, window_bounds = array<i64: 16, 128>}, {transform_indices = @transform_1, window_bounds = array<i64: 16, 128>}]} {
    %c0 = arith.constant 0 : index
    %c0_0 = arith.constant 0 : index
    %0 = vector.load %arg1[%c0, %c0_0] : memref<16x128xf32, #tpu.memory_space<vmem>>, vector<16x128xf32>
    %cst = arith.constant 0.000000e+00 : f32
    %1 = vector.broadcast %cst : f32 to vector<16x128xf32>
    %2 = arith.subf %1, %0 : vector<16x128xf32>
    %3 = math.exp %2 : vector<16x128xf32>
    %cst_1 = arith.constant 1.000000e+00 : f32
    %4 = vector.broadcast %cst_1 : f32 to vector<16x128xf32>
    %5 = arith.addf %4, %3 : vector<16x128xf32>
    %cst_2 = arith.constant 1.000000e+00 : f32
    %6 = vector.broadcast %cst_2 : f32 to vector<16x128xf32>
    %7 = arith.divf %6, %5 : vector<16x128xf32>
    %8 = arith.mulf %0, %7 : vector<16x128xf32>
    %c0_3 = arith.constant 0 : index
    %c0_4 = arith.constant 0 : index
    %9 = vector.load %arg2[%c0_3, %c0_4] : memref<16x128xf32, #tpu.memory_space<vmem>>, vector<16x128xf32>
    tpu.vector_store %arg2[%c0_3, %c0_4], %8 {strides = array<i32>} : memref<16x128xf32, #tpu.memory_space<vmem>>, vector<16x128xf32>,
    return
  }
  func.func @transform_0(%arg0: i32) -> (i32, i32) {
    %c0_i32 = arith.constant 0 : i32
    %c0_i32_0 = arith.constant 0 : i32
    return %arg0, %c0_i32 : i32, i32
  }
  func.func @transform_1(%arg0: i32) -> (i32, i32) {
    %c0_i32 = arith.constant 0 : i32
    %c0_i32_0 = arith.constant 0 : i32
    return %arg0, %c0_i32 : i32, i32
  }
}

</mosaic_0001>

<bundles_post_ra>
// kernel: tpu_custom_call.1
= control target key start
LH: loop header
LB: loop body
LE: loop exit
PB: predicated region body
PF: predicated region fallthrough
CT: control target
= control target key end

     0   :  { %6 = vsyncpa [#allocation3], 0  ;;  %s178_s0 = inlined_call_operand.hbm [shape: f32[16,128], index: 0, kind: input, shape index: {}]   ;;  %s179_s1 = inlined_call_operand.hbm [shape: f32[16,128], index: 1, kind: output, shape index: {}]  }
   0x1   :  { %7 = vsyncpa [#allocation4], 0  ;;  %s12_s8 = sshll.u32 %s178_s0, 4  ;;  %s152_s9 = smov [#allocation2]   ;;  %s13_s8 = int_to_ptr.hbm [resolvable:$true] %s12_s8 }
   0x2   :  { %s14_s10 = sshll.u32 %s152_s9, 4  ;;  %s153_s11 = smov 128   ;;  %s15_s10 = int_to_ptr.vmem [resolvable:$true] %s14_s10 }
   0x3   :  { %s154_s12 = smov 8  }
   0x4   :  { %20 = dma.hbm_to_vmem [thread:$0]  %s13_s8, 256, %s15_s10, [#allocation3], %s153_s11, %s153_s11, %s154_s12  }
   0x5   :  { %148 = dma.done.wait [#allocation3], 256  }
   0x6   :  { %149 = vsyncadd [#allocation3], 4294967040  ;;  %v25_v0 = vld [vmem:[#allocation2] sm:$0xff]  ;;  %v26_v1 = vld [vmem:[#allocation2 + $0x8] sm:$0xff]  ;;  %s155_s0 = smov [#allocation5]   ;;  %s75_s16 = sshll.u32 %s179_s1, 4  ;;  %s76_s16 = int_to_ptr.hbm [resolvable:$true] %s75_s16 }
   0x7   :  { %v27_v2 = vsub.f32 0.0, %v25_v0  ;;  %v28_v3 = vsub.f32 0.0, %v26_v1  ;;  %s73_s13 = sshll.u32 %s155_s0, 4  ;;  %s74_s13 = int_to_ptr.vmem [resolvable:$true] %s73_s13 }
   0x9   :  { %v29_v4 = vmul.f32 1.442695, %v27_v2  ;;  %v31_v5 = vmul.f32 1.442695, %v28_v3 }
   0xb   :  { %92 = vpow2.f32 %v29_v4 }
   0xc   :  { %94 = vpow2.f32 %v31_v5 }
  0x11   :  { %v93_v6 = vpop.eup %92 }
  0x12   :  { %v95_v7 = vpop.eup %94  ;;  %v33_v8 = vadd.f32 1.0, %v93_v6 }
  0x13   :  { %v34_v9 = vadd.f32 1.0, %v95_v7 }
  0x14   :  { %96 = vrcp.f32 %v33_v8  ;;  %vm40_vm0 = vweird.f32 %v33_v8  ;;  %v46_v13 = vand.u32 2147483648, %v33_v8  ;;  %v44_v16 = vand.u32 2147483647, %v33_v8 }
  0x15   :  { %98 = vrcp.f32 %v34_v9  ;;  %v61_v17 = vand.u32 2147483648, %v34_v9  ;;  %vm55_vm2 = vweird.f32 %v34_v9  ;;  %v59_v19 = vand.u32 2147483647, %v34_v9 }
  0x16   :  { %v47_v21 = vor.u32 1.1754944e-38, %v46_v13  ;;  %vm45_vm5 = vcmp.eq.f32.partialorder %v44_v16, 8.507059e+37 }
  0x17   :  { %v62_v24 = vor.u32 1.1754944e-38, %v61_v17  ;;  %vm60_vm7 = vcmp.eq.f32.partialorder %v59_v19, 8.507059e+37 }
  0x1a   :  { %v97_v10 = vpop.eup %96 }
  0x1b   :  { %v99_v11 = vpop.eup %98  ;;  %v36_v12 = vmul.f32 %v97_v10, %v33_v8  ;;  %vm41_vm1 = vweird.f32 %v97_v10 }
  0x1c   :  { %v51_v14 = vmul.f32 %v99_v11, %v34_v9  ;;  %vm56_vm3 = vweird.f32 %v99_v11  ;;  %vm42_vm4 = vmor %vm40_vm0, %vm41_vm1 }
  0x1d   :  { %v37_v15 = vsub.f32 1.0, %v36_v12  ;;  %vm57_vm6 = vmor %vm55_vm2, %vm56_vm3 }
  0x1e   :  { %v52_v18 = vsub.f32 1.0, %v51_v14 }
  0x1f   :  { %v38_v20 = vmul.f32 %v97_v10, %v37_v15 }
  0x20   :  { %v53_v22 = vmul.f32 %v99_v11, %v52_v18 }
  0x21   :  { %v39_v23 = vadd.f32 %v97_v10, %v38_v20 }
  0x22   :  { %v54_v25 = vadd.f32 %v99_v11, %v53_v22 }
  0x23   :  { %v43_v26 = vsel %vm42_vm4, %v97_v10, %v39_v23 }
  0x24   :  { %v48_v27 = vsel %vm45_vm5, %v47_v21, %v43_v26  ;;  %v58_v28 = vsel %vm57_vm6, %v99_v11, %v54_v25 }
  0x25   :  { %v65_v29 = vmul.f32 %v48_v27, %v25_v0  ;;  %v63_v30 = vsel %vm60_vm7, %v62_v24, %v58_v28 }
  0x26   :  { %v66_v31 = vmul.f32 %v63_v30, %v26_v1 }
  0x27   :  { %67 = vst [vmem:[#allocation5] sm:$0xff] %v65_v29 }
  0x28   :  { %68 = vst [vmem:[#allocation5 + $0x8] sm:$0xff] %v66_v31 }
  0x29   :  { %81 = dma.vmem_to_hbm [thread:$0]  %s74_s13, 256, %s76_s16, [#allocation4], %s153_s11, %s153_s11, %s154_s12  }
  0x2a   :  { %150 = dma.done.wait [#allocation4], 256  }
  0x2b   :  { %151 = vsyncadd [#allocation4], 4294967040 }
  0x2c   :  { %86 = vsyncpa [#allocation3], 1 }
  0x2d   :  { %87 = vsyncpa [#allocation4], 1 }

</bundles_post_ra>
